<compile_context>
chip_gen: v7x
topology: tpu7x:2x2x1
jax: 0.10.0
libtpu: 0.0.40
codegen_flags: <defaults>
</compile_context>

<pallas_src>
import jax
import jax.numpy as jnp
from jax import lax
from jax.experimental import pallas as pl
from jax.experimental.pallas import tpu as pltpu

SHAPE_IN, FIRST_IN, SECOND_IN, HIGH_IN = 17, 324, 375, 975
TOTAL_IN = SHAPE_IN + FIRST_IN + SECOND_IN + HIGH_IN   # 1691
HID = 16
CAT = 4 * HID                                          # 64
OUT_PAD = 128                                          # lane-dense output slab width
NEG_SLOPE = 0.01                                       # nn.LeakyReLU default


def _leaky_relu(x):
    return jnp.where(x > 0, x, NEG_SLOPE * x)


def radi_branch_kernel(x_ref, w1_ref, b1_ref, w2_ref, b2_ref, wo_ref, bo_ref,
                       out_ref):
    # Fused 4-branch BaseDense: [tB,1691] @ block-diagonal [1691,64].
    # x/w1 may be bf16 (default); accumulation is always f32.  With f32 inputs the
    # MXU uses its default multi-pass decomposition -- on v5e prefer the bf16 path
    # so the MXU does not become the binding unit.
    h = jnp.dot(x_ref[...], w1_ref[...],
                preferred_element_type=jnp.float32) + b1_ref[...]
    h = _leaky_relu(h)                                              # [tB, 64] == cat

    # fc_1: BaseDense(64, 16)
    f = jnp.dot(h, w2_ref[...], preferred_element_type=jnp.float32) + b2_ref[...]
    f = _leaky_relu(f)                                              # [tB, 16]

    # feature = feature / (||feature||_2 + 1e-9)  -> single EUP rsqrt.
    sumsq = jnp.sum(f * f, axis=1, keepdims=True)
    f = f * lax.rsqrt(sumsq + 1e-18)

    # Lane-dense store: [feat | pred | 0] = f @ [I_16 | W_pred^T | 0] + [0 | b_pred | 0].
    out_ref[...] = (jnp.dot(f, wo_ref[...], preferred_element_type=jnp.float32)
                    + bo_ref[...])
    # TODO(synk): nn.Dropout (dout=True ctor arg) not implemented; this kernel
    # reproduces the default module (dout=False).


def init_raw_params(key, num_classes):
    """PyTorch-style parameters for every Linear in the module (unfused)."""
    ks = jax.random.split(key, 12)

    def lin(kw, kb, fan_in, fan_out):
        bound = 1.0 / jnp.sqrt(float(fan_in))
        w = jax.random.uniform(kw, (fan_out, fan_in), jnp.float32, -bound, bound)
        b = jax.random.uniform(kb, (fan_out,), jnp.float32, -bound, bound)
        return w, b

    return {
        "shape":  lin(ks[0],  ks[1],  SHAPE_IN,  HID),
        "first":  lin(ks[2],  ks[3],  FIRST_IN,  HID),
        "second": lin(ks[4],  ks[5],  SECOND_IN, HID),
        "high":   lin(ks[6],  ks[7],  HIGH_IN,   HID),
        "fc1":    lin(ks[8],  ks[9],  CAT,       HID),
        "pred":   lin(ks[10], ks[11], HID,       num_classes),
    }


def pack_params(raw, num_classes):
    """Fuse the raw parameters into the kernel's block-diagonal / packed form."""
    assert HID + num_classes <= OUT_PAD
    (w_s, b_s), (w_f, b_f) = raw["shape"], raw["first"]
    (w_2, b_2), (w_h, b_h) = raw["second"], raw["high"]
    w_fc1, b_fc1 = raw["fc1"]
    w_p, b_p = raw["pred"]

    # Block-diagonal fused first-layer weight [1691, 64] (no K padding needed).
    o1 = SHAPE_IN
    o2 = SHAPE_IN + FIRST_IN
    o3 = SHAPE_IN + FIRST_IN + SECOND_IN
    w1 = jnp.zeros((TOTAL_IN, CAT), jnp.float32)
    w1 = w1.at[0:o1,        0 * HID:1 * HID].set(w_s.T)
    w1 = w1.at[o1:o2,       1 * HID:2 * HID].set(w_f.T)
    w1 = w1.at[o2:o3,       2 * HID:3 * HID].set(w_2.T)
    w1 = w1.at[o3:TOTAL_IN, 3 * HID:4 * HID].set(w_h.T)
    b1 = jnp.concatenate([b_s, b_f, b_2, b_h]).reshape(1, CAT)

    w2 = w_fc1.T                      # [64, 16]
    b2 = b_fc1.reshape(1, HID)

    # Packed lane-dense output projection: cols 0:16 = identity (emits feat),
    # cols 16:16+C = fc_pred weight, remaining cols zero.
    wo = jnp.zeros((HID, OUT_PAD), jnp.float32)
    wo = wo.at[:, :HID].set(jnp.eye(HID, dtype=jnp.float32))
    wo = wo.at[:, HID:HID + num_classes].set(w_p.T)
    bo = jnp.zeros((1, OUT_PAD), jnp.float32)
    bo = bo.at[:, HID:HID + num_classes].set(b_p)
    return w1, b1, w2, b2, wo, bo


def _round_up(x, m):
    return ((x + m - 1) // m) * m


def _pick_tile_b(B, x_dtype):
    # Large tiles amortize the ~0.35us per-grid-step overhead; bf16 x tiles are half
    # the bytes so they can be twice as tall for the same VMEM.
    max_tile = 2048 if jnp.dtype(x_dtype).itemsize <= 2 else 1024
    # Target >= 2 grid steps whenever B allows, so ("parallel",) actually shards the
    # batch across the 2 TensorCores on v7x (no-op on single-TC v5e/v6e).
    half = _round_up(pl.cdiv(B, 2), 8)
    tile_b = max(8, min(max_tile, half))
    if tile_b >= B:
        tile_b = B          # single tile: block dim == full array dim (always legal)
    return tile_b


def radi_branch_forward(radi, params, num_classes, *, x_dtype=jnp.bfloat16,
                        vmem_limit_bytes=48 * 1024 * 1024):
    B = radi.shape[0]
    w1, b1, w2, b2, wo, bo = params

    # Stream x (and the big weight it multiplies) at x_dtype; everything else f32.
    # (If the producer already emits x_dtype, these casts are no-ops.)
    x = radi.astype(x_dtype)
    w1 = w1.astype(x_dtype)

    tile_b = _pick_tile_b(B, x_dtype)
    grid = (pl.cdiv(B, tile_b),)

    itemsize = jnp.dtype(x_dtype).itemsize
    cost = pl.CostEstimate(
        flops=2 * B * (TOTAL_IN * CAT + CAT * HID + HID * OUT_PAD),
        transcendentals=B,
        bytes_accessed=(B * TOTAL_IN * itemsize + B * OUT_PAD * 4
                        + TOTAL_IN * CAT * itemsize
                        + 4 * (CAT + CAT * HID + HID + HID * OUT_PAD + OUT_PAD)),
    )

    out = pl.pallas_call(
        radi_branch_kernel,
        out_shape=jax.ShapeDtypeStruct((B, OUT_PAD), jnp.float32),
        grid_spec=pltpu.PrefetchScalarGridSpec(
            num_scalar_prefetch=0,
            grid=grid,
            in_specs=[
                # x streamed in (tile_b, 1691) tiles; last dim == full array dim.
                pl.BlockSpec((tile_b, TOTAL_IN), lambda i: (i, 0)),
                # Weights/biases: constant index_map -> fetched once, VMEM-resident.
                # (Single-buffering them via pl.Buffered(1) was considered per the
                #  review; the <0.5 MiB it would free is not needed at these tiles.)
                pl.BlockSpec((TOTAL_IN, CAT), lambda i: (0, 0)),
                pl.BlockSpec((1, CAT), lambda i: (0, 0)),
                pl.BlockSpec((CAT, HID), lambda i: (0, 0)),
                pl.BlockSpec((1, HID), lambda i: (0, 0)),
                pl.BlockSpec((HID, OUT_PAD), lambda i: (0, 0)),
                pl.BlockSpec((1, OUT_PAD), lambda i: (0, 0)),
            ],
            out_specs=pl.BlockSpec((tile_b, OUT_PAD), lambda i: (i, 0)),
        ),
        compiler_params=pltpu.CompilerParams(
            dimension_semantics=("parallel",),
            vmem_limit_bytes=vmem_limit_bytes),
        cost_estimate=cost,
    )(x, w1, b1, w2, b2, wo, bo)

    feat = out[:, :HID]
    pred = out[:, HID:HID + num_classes]
    return pred, feat


def reference_forward(radi, raw, num_classes):
    """Pure-JAX reference that follows the PyTorch module exactly (unfused)."""
    def base_dense(x, wb):
        w, b = wb
        y = x @ w.T + b
        return jnp.where(y > 0, y, NEG_SLOPE * y)

    shape = base_dense(radi[:, :SHAPE_IN], raw["shape"])
    first = base_dense(radi[:, SHAPE_IN:SHAPE_IN + FIRST_IN], raw["first"])
    second = base_dense(radi[:, SHAPE_IN + FIRST_IN:SHAPE_IN + FIRST_IN + SECOND_IN],
                        raw["second"])
    high = base_dense(radi[:, SHAPE_IN + FIRST_IN + SECOND_IN:], raw["high"])
    cat = jnp.concatenate([shape, first, second, high], axis=1)
    feature = base_dense(cat, raw["fc1"])
    norm = jnp.sqrt(jnp.sum(feature * feature, axis=1, keepdims=True))
    feature = feature / (norm + 1e-9)
    w_p, b_p = raw["pred"]
    pred = feature @ w_p.T + b_p
    return pred, feature


if __name__ == "__main__":
    num_classes = 3
    B = 2
    key = jax.random.PRNGKey(0)
    k_x, k_p = jax.random.split(key)
    radi = jax.random.normal(k_x, (B, TOTAL_IN), jnp.float32)

    raw = init_raw_params(k_p, num_classes)
    params = pack_params(raw, num_classes)

    ref_pred, ref_feat = reference_forward(radi, raw, num_classes)

    # Default path: bf16-streamed x / w1 (f32 accumulation).
    pred, feat = radi_branch_forward(radi, params, num_classes)
    jax.block_until_ready((pred, feat))
    assert pred.shape == (B, num_classes) and feat.shape == (B, HID)
    assert jnp.allclose(pred, ref_pred, atol=5e-2, rtol=5e-2), "bf16 pred mismatch"
    assert jnp.allclose(feat, ref_feat, atol=5e-2, rtol=5e-2), "bf16 feature mismatch"

    # f32 path (module's native dtype) — tighter tolerance (MXU default precision).
    pred32, feat32 = radi_branch_forward(radi, params, num_classes,
                                         x_dtype=jnp.float32)
    jax.block_until_ready((pred32, feat32))
    assert jnp.allclose(pred32, ref_pred, atol=2e-2, rtol=2e-2), "f32 pred mismatch"
    assert jnp.allclose(feat32, ref_feat, atol=2e-2, rtol=2e-2), "f32 feature mismatch"

    print("KERNEL_OK")
</pallas_src>

<mosaic_0001>
module attributes {stable_mosaic.version = 11 : i64} {
  func.func @radi_branch_kernel(%arg0: i32, %arg1: memref<2x1691xbf16, #tpu.memory_space<vmem>>, %arg2: memref<1691x64xbf16, #tpu.memory_space<vmem>>, %arg3: memref<1x64xf32, #tpu.memory_space<vmem>>, %arg4: memref<64x16xf32, #tpu.memory_space<vmem>>, %arg5: memref<1x16xf32, #tpu.memory_space<vmem>>, %arg6: memref<16x128xf32, #tpu.memory_space<vmem>>, %arg7: memref<1x128xf32, #tpu.memory_space<vmem>>, %arg8: memref<2x128xf32, #tpu.memory_space<vmem>>) attributes {dimension_semantics = [#tpu.dimension_semantics<parallel>], iteration_bounds = array<i64: 1>, scalar_prefetch = 0 : i64, scratch_operands = 0 : i64, tpu.core_type = #tpu.core_type<tc>, window_params = [{transform_indices = @transform_0, window_bounds = array<i64: 2, 1691>}, {pipeline_mode = #tpu.pipeline_mode<synchronous>, transform_indices = @transform_1, window_bounds = array<i64: 1691, 64>}, {pipeline_mode = #tpu.pipeline_mode<synchronous>, transform_indices = @transform_2, window_bounds = array<i64: 1, 64>}, {pipeline_mode = #tpu.pipeline_mode<synchronous>, transform_indices = @transform_3, window_bounds = array<i64: 64, 16>}, {pipeline_mode = #tpu.pipeline_mode<synchronous>, transform_indices = @transform_4, window_bounds = array<i64: 1, 16>}, {pipeline_mode = #tpu.pipeline_mode<synchronous>, transform_indices = @transform_5, window_bounds = array<i64: 16, 128>}, {pipeline_mode = #tpu.pipeline_mode<synchronous>, transform_indices = @transform_6, window_bounds = array<i64: 1, 128>}, {transform_indices = @transform_7, window_bounds = array<i64: 2, 128>}]} {
    %c0 = arith.constant 0 : index
    %c0_0 = arith.constant 0 : index
    %0 = vector.load %arg1[%c0, %c0_0] : memref<2x1691xbf16, #tpu.memory_space<vmem>>, vector<2x1691xbf16>
    %c0_1 = arith.constant 0 : index
    %c0_2 = arith.constant 0 : index
    %1 = vector.load %arg2[%c0_1, %c0_2] : memref<1691x64xbf16, #tpu.memory_space<vmem>>, vector<1691x64xbf16>
    %cst = arith.constant dense<0.000000e+00> : vector<2x64xf32>
    %2 = tpu.matmul %0, %1, %cst {dimension_numbers = #tpu.dot_dimension_numbers<[1], [0], [0], [1], [0, 0, 1, 1], [], []>} : vector<2x1691xbf16>, vector<1691x64xbf16>, vector<2x64xf32> -> vector<2x64xf32>
    %c0_3 = arith.constant 0 : index
    %c0_4 = arith.constant 0 : index
    %3 = vector.load %arg3[%c0_3, %c0_4] : memref<1x64xf32, #tpu.memory_space<vmem>>, vector<1x64xf32>
    %4 = vector.broadcast %3 : vector<1x64xf32> to vector<2x64xf32>
    %5 = arith.addf %2, %4 : vector<2x64xf32>
    %cst_5 = arith.constant 0.000000e+00 : f32
    %6 = vector.broadcast %cst_5 : f32 to vector<2x64xf32>
    %7 = arith.cmpf ogt, %5, %6 : vector<2x64xf32>
    %cst_6 = arith.constant 0.00999999977 : f32
    %8 = vector.broadcast %cst_6 : f32 to vector<2x64xf32>
    %9 = arith.mulf %8, %5 : vector<2x64xf32>
    %10 = arith.select %7, %5, %9 : vector<2x64xi1>, vector<2x64xf32>
    %c0_7 = arith.constant 0 : index
    %c0_8 = arith.constant 0 : index
    %11 = vector.load %arg4[%c0_7, %c0_8] : memref<64x16xf32, #tpu.memory_space<vmem>>, vector<64x16xf32>
    %cst_9 = arith.constant dense<0.000000e+00> : vector<2x16xf32>
    %12 = tpu.matmul %10, %11, %cst_9 {dimension_numbers = #tpu.dot_dimension_numbers<[1], [0], [0], [1], [0, 0, 1, 1], [], []>} : vector<2x64xf32>, vector<64x16xf32>, vector<2x16xf32> -> vector<2x16xf32>
    %c0_10 = arith.constant 0 : index
    %c0_11 = arith.constant 0 : index
    %13 = vector.load %arg5[%c0_10, %c0_11] : memref<1x16xf32, #tpu.memory_space<vmem>>, vector<1x16xf32>
    %14 = vector.broadcast %13 : vector<1x16xf32> to vector<2x16xf32>
    %15 = arith.addf %12, %14 : vector<2x16xf32>
    %cst_12 = arith.constant 0.000000e+00 : f32
    %16 = vector.broadcast %cst_12 : f32 to vector<2x16xf32>
    %17 = arith.cmpf ogt, %15, %16 : vector<2x16xf32>
    %cst_13 = arith.constant 0.00999999977 : f32
    %18 = vector.broadcast %cst_13 : f32 to vector<2x16xf32>
    %19 = arith.mulf %18, %15 : vector<2x16xf32>
    %20 = arith.select %17, %15, %19 : vector<2x16xi1>, vector<2x16xf32>
    %21 = arith.mulf %20, %20 : vector<2x16xf32>
    %cst_14 = arith.constant dense<0.000000e+00> : vector<2xf32>
    %22 = vector.multi_reduction <add>, %21, %cst_14 [1] : vector<2x16xf32> to vector<2xf32>
    %23 = vector.shape_cast %22 : vector<2xf32> to vector<2x1xf32>
    %cst_15 = arith.constant 1.000000e-18 : f32
    %24 = vector.broadcast %cst_15 : f32 to vector<2x1xf32>
    %25 = arith.addf %23, %24 : vector<2x1xf32>
    %26 = math.rsqrt %25 : vector<2x1xf32>
    %27 = vector.broadcast %26 : vector<2x1xf32> to vector<2x16xf32>
    %28 = arith.mulf %20, %27 : vector<2x16xf32>
    %c0_16 = arith.constant 0 : index
    %c0_17 = arith.constant 0 : index
    %29 = vector.load %arg6[%c0_16, %c0_17] : memref<16x128xf32, #tpu.memory_space<vmem>>, vector<16x128xf32>
    %cst_18 = arith.constant dense<0.000000e+00> : vector<2x128xf32>
    %30 = tpu.matmul %28, %29, %cst_18 {dimension_numbers = #tpu.dot_dimension_numbers<[1], [0], [0], [1], [0, 0, 1, 1], [], []>} : vector<2x16xf32>, vector<16x128xf32>, vector<2x128xf32> -> vector<2x128xf32>
    %c0_19 = arith.constant 0 : index
    %c0_20 = arith.constant 0 : index
    %31 = vector.load %arg7[%c0_19, %c0_20] : memref<1x128xf32, #tpu.memory_space<vmem>>, vector<1x128xf32>
    %32 = vector.broadcast %31 : vector<1x128xf32> to vector<2x128xf32>
    %33 = arith.addf %30, %32 : vector<2x128xf32>
    %c0_21 = arith.constant 0 : index
    %c0_22 = arith.constant 0 : index
    %34 = vector.load %arg8[%c0_21, %c0_22] : memref<2x128xf32, #tpu.memory_space<vmem>>, vector<2x128xf32>
    tpu.vector_store %arg8[%c0_21, %c0_22], %33 {strides = array<i32>} : memref<2x128xf32, #tpu.memory_space<vmem>>, vector<2x128xf32>,
    return
  }
  func.func @transform_0(%arg0: i32) -> (i32, i32) {
    %c0_i32 = arith.constant 0 : i32
    %c0_i32_0 = arith.constant 0 : i32
    return %arg0, %c0_i32 : i32, i32
  }
  func.func @transform_1(%arg0: i32) -> (i32, i32) {
    %c0_i32 = arith.constant 0 : i32
    %c0_i32_0 = arith.constant 0 : i32
    %c0_i32_1 = arith.constant 0 : i32
    return %c0_i32, %c0_i32_0 : i32, i32
  }
  func.func @transform_2(%arg0: i32) -> (i32, i32) {
    %c0_i32 = arith.constant 0 : i32
    %c0_i32_0 = arith.constant 0 : i32
    %c0_i32_1 = arith.constant 0 : i32
    return %c0_i32, %c0_i32_0 : i32, i32
  }
  func.func @transform_3(%arg0: i32) -> (i32, i32) {
    %c0_i32 = arith.constant 0 : i32
    %c0_i32_0 = arith.constant 0 : i32
    %c0_i32_1 = arith.constant 0 : i32
    return %c0_i32, %c0_i32_0 : i32, i32
  }
  func.func @transform_4(%arg0: i32) -> (i32, i32) {
    %c0_i32 = arith.constant 0 : i32
    %c0_i32_0 = arith.constant 0 : i32
    %c0_i32_1 = arith.constant 0 : i32
    return %c0_i32, %c0_i32_0 : i32, i32
  }
  func.func @transform_5(%arg0: i32) -> (i32, i32) {
    %c0_i32 = arith.constant 0 : i32
    %c0_i32_0 = arith.constant 0 : i32
    %c0_i32_1 = arith.constant 0 : i32
    return %c0_i32, %c0_i32_0 : i32, i32
  }
  func.func @transform_6(%arg0: i32) -> (i32, i32) {
    %c0_i32 = arith.constant 0 : i32
    %c0_i32_0 = arith.constant 0 : i32
    %c0_i32_1 = arith.constant 0 : i32
    return %c0_i32, %c0_i32_0 : i32, i32
  }
  func.func @transform_7(%arg0: i32) -> (i32, i32) {
    %c0_i32 = arith.constant 0 : i32
    %c0_i32_0 = arith.constant 0 : i32
    return %arg0, %c0_i32 : i32, i32
  }
}

</mosaic_0001>

<bundles_post_ra>
// kernel: tpu_custom_call.1
= control target key start
LH: loop header
LB: loop body
LE: loop exit
PB: predicated region body
PF: predicated region fallthrough
CT: control target
= control target key end

     0   :  { %v255_v27 = vlaneseq  ;;  %v1925_v35 = vmov 1966171168   ;;  %s2373_s0 = inlined_call_operand.vmem [shape: bf16[2,1691], index: 0, kind: input, shape index: {}]   ;;  %s2374_s1 = inlined_call_operand.vmem [shape: bf16[1691,64], index: 1, kind: input, shape index: {}]   ;;  %s2375_s2 = inlined_call_operand.vmem [shape: f32[1,64], index: 2, kind: input, shape index: {}]   ;;  %s2376_s3 = inlined_call_operand.vmem [shape: f32[64,16], index: 3, kind: input, shape index: {}]   ;;  %s2377_s4 = inlined_call_operand.vmem [shape: f32[1,16], index: 4, kind: input, shape index: {}]   ;;  %s2378_s5 = inlined_call_operand.vmem [shape: f32[16,128], index: 5, kind: input, shape index: {}]   ;;  %s2379_s6 = inlined_call_operand.vmem [shape: f32[1,128], index: 6, kind: input, shape index: {}]   ;;  %s2380_s7 = inlined_call_operand.hbm [shape: f32[2,128], index: 7, kind: output, shape index: {}]  }
   0x1   :  { %v1791_v0 = vld [vmem:[%s2374_s1 + $0x40] sm:$0xff]   ;;  %v1795_v4 = vld [vmem:[%s2374_s1 + $0x48] sm:$0xff]   ;;  %v1799_v8 = vld [vmem:[%s2374_s1 + $0x50] sm:$0xff]   ;;  %v253_v36 = vunpack.c.l.s4 %v1925_v35 }
   0x2   :  { %v1792_v1 = vld [vmem:[%s2374_s1] sm:$0xff]   ;;  %1599 = vmatprep.subr.bf16.mxu0 %v1791_v0  ;;  %v1796_v5 = vld [vmem:[%s2374_s1 + $0x8] sm:$0xff]   ;;  %v1800_v9 = vld [vmem:[%s2374_s1 + $0x10] sm:$0xff]   ;;  %v256_v32 = vshrl.u32 %v255_v27, 7 }
   0x3   :  { %v1793_v2 = vld [vmem:[%s2374_s1 + $0xc0] sm:$0xff]   ;;  %1600 = vmatpush3.bf16.msra.mxu0 %v1792_v1  ;;  %v1797_v6 = vld [vmem:[%s2374_s1 + $0xc8] sm:$0xff]   ;;  %v1801_v10 = vld [vmem:[%s2374_s1 + $0xd0] sm:$0xff]   ;;  %v254_v39 = vunpack.c.0.s8 %v253_v36 }
   0x4   :  { %v1794_v3 = vld [vmem:[%s2374_s1 + $0x80] sm:$0xff]   ;;  %1621 = vmatprep.subr.bf16.mxu1 %v1793_v2  ;;  %1601 = vmatprep.subr.bf16.mxu0 %v1795_v4  ;;  %v1798_v7 = vld [vmem:[%s2374_s1 + $0x88] sm:$0xff]   ;;  %v1802_v11 = vld [vmem:[%s2374_s1 + $0x90] sm:$0xff]  }
   0x5   :  { %1622 = vmatpush3.bf16.msra.mxu1 %v1794_v3  ;;  %v1803_v12 = vld [vmem:[%s2374_s1 + $0x58] sm:$0xff]   ;;  %v1807_v16 = vld [vmem:[%s2374_s1 + $0x60] sm:$0xff]   ;;  %v1811_v20 = vld [vmem:[%s2374_s1 + $0x68] sm:$0xff]   ;;  %v2077_v41 = vsub.s32 %v254_v39, %v256_v32 }
   0x6   :  { %1623 = vmatprep.subr.bf16.mxu1 %v1797_v6  ;;  %v1804_v13 = vld [vmem:[%s2374_s1 + $0x18] sm:$0xff]   ;;  %v1808_v17 = vld [vmem:[%s2374_s1 + $0x20] sm:$0xff]   ;;  %v1812_v21 = vld [vmem:[%s2374_s1 + $0x28] sm:$0xff]  }
   0x7   :  { %1602 = vmatpush3.bf16.msra.mxu0 %v1796_v5  ;;  %v1805_v14 = vld [vmem:[%s2374_s1 + $0xd8] sm:$0xff]   ;;  %v1809_v18 = vld [vmem:[%s2374_s1 + $0xe0] sm:$0xff]   ;;  %v1813_v22 = vld [vmem:[%s2374_s1 + $0xe8] sm:$0xff]  }
   0x8   :  { %1603 = vmatprep.subr.bf16.mxu0 %v1799_v8  ;;  %v1806_v15 = vld [vmem:[%s2374_s1 + $0x98] sm:$0xff]   ;;  %v1810_v19 = vld [vmem:[%s2374_s1 + $0xa0] sm:$0xff]   ;;  %v1814_v23 = vld [vmem:[%s2374_s1 + $0xa8] sm:$0xff]  }
   0x9   :  { %1624 = vmatpush3.bf16.msra.mxu1 %v1798_v7  ;;  %v1815_v24 = vld [vmem:[%s2374_s1 + $0x70] sm:$0xff]   ;;  %v1819_v29 = vld [vmem:[%s2374_s1 + $0x78] sm:$0xff]   ;;  %v28_v33 = vld [vmem:[%s2373_s0] sm:$0xff] }
   0xa   :  { %1625 = vmatprep.subr.bf16.mxu1 %v1801_v10  ;;  %v1816_v25 = vld [vmem:[%s2374_s1 + $0x30] sm:$0xff]   ;;  %v1820_v30 = vld [vmem:[%s2374_s1 + $0x38] sm:$0xff]   ;;  %v1824_v37 = vld [vmem:[%s2374_s1 + $0x140] sm:$0xff]   ;;  %v251_v38 = vcombine.high %v28_v33, %v28_v33  ;;  %v258_v42 = vrot.slane %v28_v33, %v2077_v41 }
   0xb   :  { %1604 = vmatpush3.bf16.msra.mxu0 %v1800_v9  ;;  %v1817_v26 = vld [vmem:[%s2374_s1 + $0xf0] sm:$0xff]   ;;  %v1821_v31 = vld [vmem:[%s2374_s1 + $0xf8] sm:$0xff]   ;;  %v1826_v40 = vld [vmem:[%s2374_s1 + $0x1c0] sm:$0xff]  }
   0xc   :  { %1605 = vmatprep.subr.bf16.mxu0 %v1803_v12  ;;  %v1818_v28 = vld [vmem:[%s2374_s1 + $0xb0] sm:$0xff]   ;;  %v1823_v34 = vld [vmem:[%s2374_s1 + $0xb8] sm:$0xff]   ;;  %v2081_v43 = vrot.slane %v251_v38, %v2077_v41  ;;  %v266_v44 = vcombine.high %v258_v42, %v258_v42  ;;  %v274_v45 = vrot.slane %v258_v42, %v2077_v41  ;;  %v1825_v48 = vld [vmem:[%s2374_s1 + $0x100] sm:$0xff]  }
   0xd   :  { %1626 = vmatpush3.bf16.msra.mxu1 %v1802_v11  ;;  %v1828_v51 = vld [vmem:[%s2374_s1 + $0x148] sm:$0xff]   ;;  %v1827_v53 = vld [vmem:[%s2374_s1 + $0x180] sm:$0xff]   ;;  %v1832_v57 = vld [vmem:[%s2374_s1 + $0x150] sm:$0xff]  }
   0xe   :  { %1627 = vmatprep.subr.bf16.mxu1 %v1805_v14  ;;  %v267_v46 = vcombine.high %v2081_v43, %v2081_v43  ;;  %v288_v47 = vrot.slane %v266_v44, %v2077_v41  ;;  %v296_v50 = vcombine.high %v274_v45, %v274_v45  ;;  %v1830_v54 = vld [vmem:[%s2374_s1 + $0x1c8] sm:$0xff]   ;;  %v1834_v59 = vld [vmem:[%s2374_s1 + $0x1d0] sm:$0xff]   ;;  %v1836_v61 = vld [vmem:[%s2374_s1 + $0x158] sm:$0xff]  }
   0xf   :  { %1606 = vmatpush3.bf16.msra.mxu0 %v1804_v13  ;;  %v1829_v56 = vld [vmem:[%s2374_s1 + $0x108] sm:$0xff]   ;;  %v1833_v60 = vld [vmem:[%s2374_s1 + $0x110] sm:$0xff]   ;;  %v1838_v63 = vld [vmem:[%s2374_s1 + $0x1d8] sm:$0xff]  }
  0x10   :  { %1607 = vmatprep.subr.bf16.mxu0 %v1807_v16  ;;  %v295_v49 = vrot.slane %v267_v46, %v2077_v41  ;;  %1038 = vmatprep.mubr.bf16.mxu0 %v288_v47  ;;  %v298_v52 = vcombine.high %v288_v47, %v288_v47  ;;  %v1831_v58 = vld [vmem:[%s2374_s1 + $0x188] sm:$0xff]   ;;  %v1835_v62 = vld [vmem:[%s2374_s1 + $0x190] sm:$0xff]   ;;  %v1837_v0 = vld [vmem:[%s2374_s1 + $0x118] sm:$0xff]  }
  0x11   :  { %1628 = vmatpush3.bf16.msra.mxu1 %v1806_v15  ;;  %v1840_v1 = vld [vmem:[%s2374_s1 + $0x160] sm:$0xff]   ;;  %v1839_v2 = vld [vmem:[%s2374_s1 + $0x198] sm:$0xff]   ;;  %v1844_v5 = vld [vmem:[%s2374_s1 + $0x168] sm:$0xff]  }
  0x12   :  { %1629 = vmatprep.subr.bf16.mxu1 %v1809_v18  ;;  %v299_v55 = vcombine.high %v295_v49, %v295_v49  ;;  %1078 = vmatprep.mubr.bf16.mxu1 %v298_v52  ;;  %v1842_v3 = vld [vmem:[%s2374_s1 + $0x1e0] sm:$0xff]   ;;  %v1846_v7 = vld [vmem:[%s2374_s1 + $0x1e8] sm:$0xff]   ;;  %v1848_v9 = vld [vmem:[%s2374_s1 + $0x170] sm:$0xff]  }
  0x13   :  { %1608 = vmatpush3.bf16.msra.mxu0 %v1808_v17  ;;  %v1841_v4 = vld [vmem:[%s2374_s1 + $0x120] sm:$0xff]   ;;  %v1845_v8 = vld [vmem:[%s2374_s1 + $0x128] sm:$0xff]   ;;  %v1850_v11 = vld [vmem:[%s2374_s1 + $0x1f0] sm:$0xff]   ;;  %v281_v17 = vrot.slane %v2081_v43, %v2077_v41 }
  0x14   :  { %1609 = vmatprep.subr.bf16.mxu0 %v1811_v20  ;;  %v1843_v6 = vld [vmem:[%s2374_s1 + $0x1a0] sm:$0xff]   ;;  %v1847_v10 = vld [vmem:[%s2374_s1 + $0x1a8] sm:$0xff]   ;;  %v1849_v12 = vld [vmem:[%s2374_s1 + $0x130] sm:$0xff]  }
  0x15   :  { %1630 = vmatpush3.bf16.msra.mxu1 %v1810_v19  ;;  %v1852_v13 = vld [vmem:[%s2374_s1 + $0x178] sm:$0xff]   ;;  %v1851_v14 = vld [vmem:[%s2374_s1 + $0x1b0] sm:$0xff]   ;;  %v1856_v18 = vld [vmem:[%s2374_s1 + $0x240] sm:$0xff]  }
  0x16   :  { %1631 = vmatprep.subr.bf16.mxu1 %v1813_v22  ;;  %v1854_v15 = vld [vmem:[%s2374_s1 + $0x1f8] sm:$0xff]   ;;  %v1858_v20 = vld [vmem:[%s2374_s1 + $0x2c0] sm:$0xff]   ;;  %v297_v22 = vcombine.high %v281_v17, %v281_v17  ;;  %v1864_v27 = vld [vmem:[%s2374_s1 + $0x250] sm:$0xff]  }
  0x17   :  { %1610 = vmatpush3.bf16.msra.mxu0 %v1812_v21  ;;  %v1853_v16 = vld [vmem:[%s2374_s1 + $0x138] sm:$0xff]   ;;  %v1857_v21 = vld [vmem:[%s2374_s1 + $0x200] sm:$0xff]   ;;  %v1867_v32 = vld [vmem:[%s2374_s1 + $0x290] sm:$0xff]  }
  0x18   :  { %1611 = vmatprep.subr.bf16.mxu0 %v1815_v24  ;;  %v1855_v19 = vld [vmem:[%s2374_s1 + $0x1b8] sm:$0xff]   ;;  %v1859_v24 = vld [vmem:[%s2374_s1 + $0x280] sm:$0xff]   ;;  %v1876_v39 = vld [vmem:[%s2374_s1 + $0x268] sm:$0xff]  }
  0x19   :  { %1632 = vmatpush3.bf16.msra.mxu1 %v1814_v23  ;;  %v1860_v23 = vld [vmem:[%s2374_s1 + $0x248] sm:$0xff]   ;;  %v1870_v33 = vld [vmem:[%s2374_s1 + $0x2d8] sm:$0xff]   ;;  %v1872_v35 = vld [vmem:[%s2374_s1 + $0x260] sm:$0xff]  }
  0x1a   :  { %1633 = vmatprep.subr.bf16.mxu1 %v1817_v26  ;;  %v1861_v26 = vld [vmem:[%s2374_s1 + $0x208] sm:$0xff]   ;;  %v1871_v36 = vld [vmem:[%s2374_s1 + $0x298] sm:$0xff]   ;;  %v1873_v38 = vld [vmem:[%s2374_s1 + $0x220] sm:$0xff]  }
  0x1b   :  { %1612 = vmatpush3.bf16.msra.mxu0 %v1816_v25  ;;  %v1862_v25 = vld [vmem:[%s2374_s1 + $0x2c8] sm:$0xff]   ;;  %v1880_v44 = vld [vmem:[%s2374_s1 + $0x270] sm:$0xff]  }
  0x1c   :  { %1613 = vmatprep.subr.bf16.mxu0 %v1819_v29  ;;  %v1866_v29 = vld [vmem:[%s2374_s1 + $0x2d0] sm:$0xff]   ;;  %v1878_v42 = vld [vmem:[%s2374_s1 + $0x2e8] sm:$0xff]  }
  0x1d   :  { %1634 = vmatpush3.bf16.msra.mxu1 %v1818_v28  ;;  %v1863_v28 = vld [vmem:[%s2374_s1 + $0x288] sm:$0xff]  }
  0x1e   :  { %1635 = vmatprep.subr.bf16.mxu1 %v1821_v31  ;;  %v1868_v31 = vld [vmem:[%s2374_s1 + $0x258] sm:$0xff]   ;;  %v1877_v43 = vld [vmem:[%s2374_s1 + $0x228] sm:$0xff]  }
  0x1f   :  { %1614 = vmatpush3.bf16.msra.mxu0 %v1820_v30  ;;  %v1865_v30 = vld [vmem:[%s2374_s1 + $0x210] sm:$0xff]   ;;  %v1879_v46 = vld [vmem:[%s2374_s1 + $0x2a8] sm:$0xff]  }
  0x20   :  { %1643 = vmatprep.subr.bf16.mxu0 %v1824_v37  ;;  %v1874_v37 = vld [vmem:[%s2374_s1 + $0x2e0] sm:$0xff]  }
  0x21   :  { %1636 = vmatpush3.bf16.msra.mxu1 %v1823_v34  ;;  %v1869_v34 = vld [vmem:[%s2374_s1 + $0x218] sm:$0xff]  }
  0x22   :  { %1665 = vmatprep.subr.bf16.mxu1 %v1826_v40  ;;  %1039 = vmatmul.mubr.bf16.vlgmr.msra.gmra.mrb[0].mxu0 %v274_v45  ;;  %v1875_v40 = vld [vmem:[%s2374_s1 + $0x2a0] sm:$0xff]   ;;  %v29_v45 = vld [vmem:[%s2373_s0 + $0x8] sm:$0x3f] }
  0x23   :  { %1644 = vmatpush3.bf16.msra.mxu0 %v1825_v48  ;;  %1118 = vmatprep.mubr.bf16.mxu0 %v295_v49  ;;  %v300_v47 = vcombine.high %v29_v45, %v29_v45  ;;  %v307_v48 = vrot.slane %v29_v45, %v2077_v41  ;;  %v1882_v49 = vld [vmem:[%s2374_s1 + $0x2f0] sm:$0xff]  }
  0x24   :  { %1079 = vmatmul.mubr.bf16.vlgmr.msra.gmra.mrb[0].mxu1 %v296_v50  ;;  %1645 = vmatprep.subr.bf16.mxu0 %v1828_v51  ;;  %v1881_v50 = vld [vmem:[%s2374_s1 + $0x230] sm:$0xff]  }
  0x25   :  { %1666 = vmatpush3.bf16.msra.mxu1 %v1827_v53  ;;  %1158 = vmatprep.mubr.bf16.mxu1 %v299_v55  ;;  %v315_v51 = vcombine.high %v307_v48, %v307_v48  ;;  %v2266_v52 = vrot.slane %v300_v47, %v2077_v41  ;;  %v1884_v53 = vld [vmem:[%s2374_s1 + $0x278] sm:$0xff]  }
  0x26   :  { %1667 = vmatprep.subr.bf16.mxu1 %v1830_v54  ;;  %v1883_v54 = vld [vmem:[%s2374_s1 + $0x2b0] sm:$0xff]  }
  0x27   :  { %1646 = vmatpush3.bf16.msra.mxu0 %v1829_v56  ;;  %v337_v55 = vrot.slane %v315_v51, %v2077_v41  ;;  %v1886_v56 = vld [vmem:[%s2374_s1 + $0x2f8] sm:$0xff]  }
  0x28   :  { %1647 = vmatprep.subr.bf16.mxu0 %v1832_v57  ;;  %v1885_v57 = vld [vmem:[%s2374_s1 + $0x238] sm:$0xff]  }
  0x29   :  { %1668 = vmatpush3.bf16.msra.mxu1 %v1831_v58  ;;  %v346_v58 = vcombine.high %v337_v55, %v337_v55 }
  0x2a   :  { %1669 = vmatprep.subr.bf16.mxu1 %v1834_v59  ;;  %v316_v59 = vcombine.high %v2266_v52, %v2266_v52 }
  0x2b   :  { %1648 = vmatpush3.bf16.msra.mxu0 %v1833_v60  ;;  %v323_v60 = vrot.slane %v307_v48, %v2077_v41 }
  0x2c   :  { %1649 = vmatprep.subr.bf16.mxu0 %v1836_v61  ;;  %v1888_v61 = vld [vmem:[%s2374_s1 + $0x2b8] sm:$0xff]  }
  0x2d   :  { %1670 = vmatpush3.bf16.msra.mxu1 %v1835_v62  ;;  %v1889_v62 = vld [vmem:[%s2374_s1 + $0x300] sm:$0xff]  }
  0x2e   :  { %1671 = vmatprep.subr.bf16.mxu1 %v1838_v63  ;;  %v344_v63 = vrot.slane %v316_v59, %v2077_v41 }
  0x2f   :  { %1650 = vmatpush3.bf16.msra.mxu0 %v1837_v0 }
  0x30   :  { %1651 = vmatprep.subr.bf16.mxu0 %v1840_v1 }
  0x31   :  { %1672 = vmatpush3.bf16.msra.mxu1 %v1839_v2 }
  0x32   :  { %1673 = vmatprep.subr.bf16.mxu1 %v1842_v3 }
  0x33   :  { %1652 = vmatpush3.bf16.msra.mxu0 %v1841_v4 }
  0x34   :  { %1653 = vmatprep.subr.bf16.mxu0 %v1844_v5 }
  0x35   :  { %1674 = vmatpush3.bf16.msra.mxu1 %v1843_v6 }
  0x36   :  { %1675 = vmatprep.subr.bf16.mxu1 %v1846_v7 }
  0x37   :  { %1654 = vmatpush3.bf16.msra.mxu0 %v1845_v8 }
  0x38   :  { %1655 = vmatprep.subr.bf16.mxu0 %v1848_v9 }
  0x39   :  { %1676 = vmatpush3.bf16.msra.mxu1 %v1847_v10 }
  0x3a   :  { %1677 = vmatprep.subr.bf16.mxu1 %v1850_v11 }
  0x3b   :  { %1656 = vmatpush3.bf16.msra.mxu0 %v1849_v12 }
  0x3c   :  { %1657 = vmatprep.subr.bf16.mxu0 %v1852_v13 }
  0x3d   :  { %1678 = vmatpush3.bf16.msra.mxu1 %v1851_v14 }
  0x3e   :  { %1679 = vmatprep.subr.bf16.mxu1 %v1854_v15 }
  0x3f   :  { %1658 = vmatpush3.bf16.msra.mxu0 %v1853_v16 }
  0x40   :  { %1687 = vmatprep.subr.bf16.mxu0 %v1856_v18 }
  0x41   :  { %1680 = vmatpush3.bf16.msra.mxu1 %v1855_v19 }
  0x42   :  { %1119 = vmatmul.mubr.bf16.vlgmr.msra.gmra.mrb[4].mxu0 %v281_v17  ;;  %1709 = vmatprep.subr.bf16.mxu1 %v1858_v20 }
  0x43   :  { %1688 = vmatpush3.bf16.msra.mxu0 %v1857_v21  ;;  %1198 = vmatprep.mubr.bf16.mxu0 %v337_v55 }
  0x44   :  { %1159 = vmatmul.mubr.bf16.vlgmr.msra.gmra.mrb[4].mxu1 %v297_v22  ;;  %1689 = vmatprep.subr.bf16.mxu0 %v1860_v23 }
  0x45   :  { %1710 = vmatpush3.bf16.msra.mxu1 %v1859_v24  ;;  %1238 = vmatprep.mubr.bf16.mxu1 %v346_v58 }
  0x46   :  { %1711 = vmatprep.subr.bf16.mxu1 %v1862_v25 }
  0x47   :  { %1690 = vmatpush3.bf16.msra.mxu0 %v1861_v26 }
  0x48   :  { %1691 = vmatprep.subr.bf16.mxu0 %v1864_v27 }
  0x49   :  { %1712 = vmatpush3.bf16.msra.mxu1 %v1863_v28 }
  0x4a   :  { %1713 = vmatprep.subr.bf16.mxu1 %v1866_v29 }
  0x4b   :  { %1692 = vmatpush3.bf16.msra.mxu0 %v1865_v30 }
  0x4c   :  { %1693 = vmatprep.subr.bf16.mxu0 %v1868_v31 }
  0x4d   :  { %1714 = vmatpush3.bf16.msra.mxu1 %v1867_v32 }
  0x4e   :  { %1715 = vmatprep.subr.bf16.mxu1 %v1870_v33 }
  0x4f   :  { %1694 = vmatpush3.bf16.msra.mxu0 %v1869_v34 }
  0x50   :  { %1695 = vmatprep.subr.bf16.mxu0 %v1872_v35 }
  0x51   :  { %1716 = vmatpush3.bf16.msra.mxu1 %v1871_v36 }
  0x52   :  { %1717 = vmatprep.subr.bf16.mxu1 %v1874_v37 }
  0x53   :  { %1696 = vmatpush3.bf16.msra.mxu0 %v1873_v38 }
  0x54   :  { %1697 = vmatprep.subr.bf16.mxu0 %v1876_v39 }
  0x55   :  { %1718 = vmatpush3.bf16.msra.mxu1 %v1875_v40 }
  0x56   :  { %1719 = vmatprep.subr.bf16.mxu1 %v1878_v42 }
  0x57   :  { %1698 = vmatpush3.bf16.msra.mxu0 %v1877_v43 }
  0x58   :  { %1699 = vmatprep.subr.bf16.mxu0 %v1880_v44 }
  0x59   :  { %1720 = vmatpush3.bf16.msra.mxu1 %v1879_v46 }
  0x5a   :  { %1721 = vmatprep.subr.bf16.mxu1 %v1882_v49 }
  0x5b   :  { %1700 = vmatpush3.bf16.msra.mxu0 %v1881_v50 }
  0x5c   :  { %1701 = vmatprep.subr.bf16.mxu0 %v1884_v53 }
  0x5d   :  { %1722 = vmatpush3.bf16.msra.mxu1 %v1883_v54 }
  0x5e   :  { %1723 = vmatprep.subr.bf16.mxu1 %v1886_v56 }
  0x5f   :  { %1702 = vmatpush3.bf16.msra.mxu0 %v1885_v57 }
  0x60   :  { %12 = vsyncpa [#allocation3], 0  ;;  %v1926_v0 = vmov 0   ;;  %v345_v1 = vcombine.high %v323_v60, %v323_v60  ;;  %vm995_vm0 = vcmask 220160   ;;  %v1890_v2 = vld [vmem:[%s2374_s1 + $0x308] sm:$0xff]   ;;  %v1891_v3 = vld [vmem:[%s2374_s1 + $0x310] sm:$0xff]   ;;  %v330_v15 = vrot.slane %v2266_v52, %v2077_v41 }
  0x61   :  { %1246 = vmatprep.subr.bf16.mxu0 %v1926_v0  ;;  %1724 = vmatpush3.bf16.msra.mxu1 %v1888_v61  ;;  %v1892_v4 = vld [vmem:[%s2374_s1 + $0x318] sm:$0xff]   ;;  %v1893_v5 = vld [vmem:[%s2374_s1 + $0x320] sm:$0xff]   ;;  %v1894_v6 = vld [vmem:[%s2374_s1 + $0x328] sm:$0xff]   ;;  %vm999_vm1 = vcmask 1044480   ;;  %vm1000_vm2 = vcmask 1045504   ;;  %v1927_v9 = vmov 65535  }
  0x62   :  { %1199 = vmatmul.mubr.bf16.vlgmr.msra.gmra.mrb[8].mxu0 %v323_v60  ;;  %v1895_v7 = vld [vmem:[%s2374_s1 + $0x330] sm:$0xff]   ;;  %v1896_v8 = vld [vmem:[%s2374_s1 + $0x338] sm:$0xff]   ;;  %v1001_v10 = vsel %vm999_vm1, 4294967295, %v1927_v9  ;;  %v1897_v11 = vld [vmem:[%s2374_s1 + $0x340] sm:$0xff]   ;;  %v1928_v18 = vmov 0.0|0.0   ;;  %vm1929_vm3 = vmmov 0  }
  0x63   :  { %1247 = vmatpush1.bf16.msra.mxu0 %v1889_v62  ;;  %1594 = vmatprep.mubr.msk.bf16.mxu0 %vm995_vm0, %v344_v63  ;;  %v1898_v12 = vld [vmem:[%s2374_s1 + $0x348] sm:$0x3f]   ;;  %v1002_v13 = vsel %vm1000_vm2, %v1001_v10, 0  ;;  %v1289_v16 = vld [vmem:[%s2376_s3] sm:$0xff]  ;;  %v1291_v20 = vld [vmem:[%s2376_s3 + $0x10] sm:$0xff]  ;;  %v1930_v28 = vmov 0.0  }
  0x64   :  { %1239 = vmatmul.mubr.bf16.vlgmr.msra.gmra.mrb[8].mxu1 %v345_v1  ;;  %1248 = vmatprep.subr.bf16.mxu0 %v1926_v0  ;;  %v1004_v14 = vand.u32 %v1898_v12, %v1002_v13  ;;  %v1290_v17 = vld [vmem:[%s2376_s3 + $0x8] sm:$0xff]  ;;  %v1292_v41 = vld [vmem:[%s2376_s3 + $0x18] sm:$0xff]  ;;  %v1293_v22 = vld [vmem:[%s2376_s3 + $0x20] sm:$0xff]  ;;  %vm1304_vm5 = vcmask 523264   ;;  %vm1382_vm7 = vcmask 123904   ;;  %vm1398_vm8 = vcmask 130048  }
  0x65   :  { %1769 = vmatprep.subr.bf16.mxu1 %v1928_v18  ;;  %v1770_v19 = vpack.c.bf16 %v1290_v17, %v1289_v16  ;;  %v1773_v21 = vpack.c.bf16 %v1292_v41, %v1291_v20  ;;  %v1294_v23 = vld [vmem:[%s2376_s3 + $0x28] sm:$0xff]  ;;  %v1295_v25 = vld [vmem:[%s2376_s3 + $0x30] sm:$0xff]  ;;  %v1296_v26 = vld [vmem:[%s2376_s3 + $0x38] sm:$0xff]  ;;  %1759 = vmatprep.mubr.msk.f32.mxu1 %vm1929_vm3, %v1930_v28  ;;  %s1931_s29 = smov [#allocation2]  }
  0x66   :  { %v1776_v24 = vpack.c.bf16 %v1294_v23, %v1293_v22  ;;  %v1779_v27 = vpack.c.bf16 %v1296_v26, %v1295_v25  ;;  %v1487_v30 = vld [vmem:[%s2375_s2] ss:$0 sm:$0xff]  ;;  %s1479_s30 = sshll.u32 %s1931_s29, 4  ;;  %s1480_s30 = int_to_ptr.vmem [resolvable:$true] %s1479_s30 }
  0x67   :  { %1249 = vmatpush1.bf16.msra.mxu0 %v1890_v2  ;;  %1771 = vmatpush3.bf16.msra.mxu1 %v1770_v19  ;;  %v1595_v10 = vld [vmem:[%s2377_s4] ss:$0 sm:$0xff]  ;;  %v1390_v19 = vld [vmem:[%s2378_s5 + $0x8] sm:$0xff]  ;;  %p1906_p1 = scmp.lt.s32.totalorder %s1480_s30, %s1480_s30 }
  0x68   :  { %1250 = vmatprep.subr.bf16.mxu0 %v1926_v0  ;;  %1772 = vmatprep.subr.bf16.mxu1 %v1928_v18 }
  0x6b   :  { %1251 = vmatpush1.bf16.msra.mxu0 %v1891_v3  ;;  %1774 = vmatpush3.bf16.msra.mxu1 %v1773_v21 }
  0x6c   :  { %1252 = vmatprep.subr.bf16.mxu0 %v1926_v0  ;;  %1775 = vmatprep.subr.bf16.mxu1 %v1928_v18 }
  0x6f   :  { %1253 = vmatpush1.bf16.msra.mxu0 %v1892_v4  ;;  %1777 = vmatpush3.bf16.msra.mxu1 %v1776_v24  ;;  %v1597_v24 = vld [vmem:[%s2379_s6] ss:$0 sm:$0xff] }
  0x70   :  { %1254 = vmatprep.subr.bf16.mxu0 %v1926_v0  ;;  %1778 = vmatprep.subr.bf16.mxu1 %v1928_v18 }
  0x73   :  { %1255 = vmatpush1.bf16.msra.mxu0 %v1893_v5  ;;  %1780 = vmatpush3.bf16.msra.mxu1 %v1779_v27 }
  0x74   :  { %1256 = vmatprep.subr.bf16.mxu0 %v1926_v0  ;;  %1781 = vmatprep.subr.bf16.mxu1 %v1928_v18  ;;  %v1389_v18 = vld [vmem:[%s2378_s5] sm:$0xff]  ;;  %s1901_s5 = scalar_lea.vmem %s1480_s30, 32 }
  0x75   :  { %v1782_v20 = vpack.c.bf16 %v1390_v19, %v1389_v18  ;;  %p1902_p0 = scmp.ne.s32.totalorder %s1480_s30, %s1901_s5  ;;  %p1907_p2 = scmp.lt.s32.totalorder %s1901_s5, %s1901_s5 }
  0x77   :  { %1257 = vmatpush1.bf16.msra.mxu0 %v1894_v6  ;;  %p1908_p3 = por %p1907_p2, %p1906_p1 }
  0x78   :  { %1258 = vmatprep.subr.bf16.mxu0 %v1926_v0 }
  0x79   :  { %p1909_p4 = pnand %p1908_p3, %p1902_p0 }
  0x7b   :  { %1259 = vmatpush1.bf16.msra.mxu0 %v1895_v7 }
  0x7c   :  { %1260 = vmatprep.subr.bf16.mxu0 %v1926_v0 }
  0x7f   :  { %1261 = vmatpush1.bf16.msra.mxu0 %v1896_v8 }
  0x80   :  { %1262 = vmatprep.subr.bf16.mxu0 %v1926_v0 }
  0x83   :  { %1263 = vmatpush1.bf16.msra.mxu0 %v1897_v11 }
  0x84   :  { %1264 = vmatprep.subr.bf16.mxu0 %v1926_v0 }
  0x87   :  { %1265 = vmatpush1.bf16.msra.mxu0 %v1004_v14 }
  0x8a   :  { %1279 = vmatmul.mubr.bf16.vlgmr.msra.gmra.mrb[12].mxu0 %v330_v15 }
  0xf5   :  { %v1615_v29 = vpop.f32.mrb[0].mxu0 }
  0xf6   :  { %v1616_v31 = vpop.f32.mrb[1].mxu0 }
  0xf7   :  { %v1617_v32 = vadd.f32 %v1616_v31, %v1615_v29  ;;  %v1618_v33 = vpop.f32.mrb[2].mxu0  ;;  %v1637_v34 = vpop.f32.mrb[0].mxu1 }
  0xf8   :  { %v1619_v35 = vpop.f32.mrb[3].mxu0  ;;  %v1638_v36 = vpop.f32.mrb[1].mxu1 }
  0xf9   :  { %v1041_v37 = vadd.f32 %v1617_v32, %v1487_v30  ;;  %v1639_v38 = vadd.f32 %v1638_v36, %v1637_v34  ;;  %v1640_v39 = vpop.f32.mrb[2].mxu1 }
  0xfa   :  { %v1641_v40 = vpop.f32.mrb[3].mxu1 }
  0xfb   :  { %v1081_v42 = vadd.f32 %v1639_v38, %v1041_v37 }
 0x115   :  { %v1659_v43 = vpop.f32.mrb[4].mxu0 }
 0x116   :  { %v1660_v44 = vpop.f32.mrb[5].mxu0 }
 0x117   :  { %v1661_v45 = vadd.f32 %v1660_v44, %v1659_v43  ;;  %v1662_v46 = vpop.f32.mrb[6].mxu0  ;;  %v1681_v47 = vpop.f32.mrb[4].mxu1 }
 0x118   :  { %v1663_v48 = vpop.f32.mrb[7].mxu0  ;;  %v1682_v49 = vpop.f32.mrb[5].mxu1 }
 0x119   :  { %v1121_v50 = vadd.f32 %v1661_v45, %v1081_v42  ;;  %v1683_v51 = vadd.f32 %v1682_v49, %v1681_v47  ;;  %v1684_v52 = vpop.f32.mrb[6].mxu1 }
 0x11a   :  { %v1685_v53 = vpop.f32.mrb[7].mxu1 }
 0x11b   :  { %v1161_v54 = vadd.f32 %v1683_v51, %v1121_v50 }
 0x135   :  { %v1703_v55 = vpop.f32.mrb[8].mxu0 }
 0x136   :  { %v1704_v56 = vpop.f32.mrb[9].mxu0 }
 0x137   :  { %v1705_v57 = vadd.f32 %v1704_v56, %v1703_v55  ;;  %v1706_v58 = vpop.f32.mrb[10].mxu0  ;;  %v1725_v59 = vpop.f32.mrb[8].mxu1 }
 0x138   :  { %v1707_v60 = vpop.f32.mrb[11].mxu0  ;;  %v1726_v61 = vpop.f32.mrb[9].mxu1 }
 0x139   :  { %v1201_v62 = vadd.f32 %v1705_v57, %v1161_v54  ;;  %v1727_v63 = vadd.f32 %v1726_v61, %v1725_v59  ;;  %v1728_v0 = vpop.f32.mrb[10].mxu1 }
 0x13a   :  { %v1729_v1 = vpop.f32.mrb[11].mxu1 }
 0x13b   :  { %v1241_v2 = vadd.f32 %v1727_v63, %v1201_v62 }
 0x15d   :  { %v1280_v3 = vpop.f32.mrb[12].mxu0 }
 0x15e   :  { %v1281_v4 = vadd.f32 %v1280_v3, %v1241_v2  ;;  %v1282_v5 = vpop.f32.mrb[13].mxu0 }
 0x15f   :  { %v1283_v6 = vpop.f32.mrb[14].mxu0 }
 0x160   :  { %vm1286_vm4 = vcmp.gt.f32.partialorder %v1281_v4, 0.0  ;;  %v1287_v7 = vmul.f32 0.01, %v1281_v4  ;;  %v1284_v8 = vpop.f32.mrb[15].mxu0 }
 0x162   :  { %v1288_v9 = vsel %vm1286_vm4, %v1281_v4, %v1287_v7 }
 0x163   :  { %1760 = vmatmul.mubr.msk.f32.vlgmr.msra.gmra.mrb[12].mxu1 %vm1304_vm5, %v1288_v9 }
 0x164   :  { %1766 = vmatprep.mubr.msk.f32.mxu1 %vm1929_vm3, %v1930_v28  ;;  %1783 = vmatpush3.bf16.msra.mxu1 %v1782_v20 }
 0x236   :  { %v1374_v11 = vpop.f32.mrb[12].mxu1 }
 0x237   :  { %v1375_v12 = vadd.f32 %v1595_v10, %v1374_v11  ;;  %v1761_v13 = vpop.f32.mrb[13].mxu1 }
 0x239   :  { %v1379_v14 = vmul.f32 0.01, %v1375_v12  ;;  %vm1378_vm6 = vcmp.gt.f32.partialorder %v1375_v12, 0.0 }
 0x23b   :  { %v1380_v15 = vsel %vm1378_vm6, %v1375_v12, %v1379_v14 }
 0x23c   :  { %v1381_v16 = vmul.f32 %v1380_v15, %v1380_v15 }
 0x23e   :  { %v1383_v17 = vsel %vm1382_vm7, %v1381_v16, 0.0 }
 0x23f   :  { %1384 = vadd.xlane.f32.xlu0 %v1383_v17 }
 0x2cc   :  { %v1385_v41 = vpop.xlane.xlu0 %1384 }
 0x2cd   :  { %v1386_v21 = vadd.f32 1e-18, %v1385_v41 }
 0x2cf   :  { %1899 = vrsqrt.f32 %v1386_v21 }
 0x2d9   :  { %v1900_v22 = vpop.eup %1899 }
 0x2da   :  { %v1388_v23 = vmul.f32 %v1900_v22, %v1380_v15 }
 0x2dc   :  { %1767 = vmatmul.mubr.msk.f32.vlgmr.msra.gmra.mrb[14].mxu1 %vm1398_vm8, %v1388_v23 }
 0x3af   :  { %v1468_v25 = vpop.f32.mrb[14].mxu1 }
 0x3b0   :  { %v1469_v26 = vadd.f32 %v1597_v24, %v1468_v25  ;;  %v1768_v27 = vpop.f32.mrb[15].mxu1 }
 0x3b2   :  { %1472 = vst [vmem:[#allocation2] sm:$0x3] %v1469_v26 }
 0x3b3   :  { %1912 = shalt.err (!%p1909_p4)
}
 0x3b4   :  { %s1913_s10 = scalar_lea.hbm %s2380_s7, 32 }
 0x3b5   :  { %p1914_p5 = scmp.ne.s32.totalorder %s2380_s7, %s1913_s10  ;;  %p1917_p6 = scmp.lt.u32.totalorder %s1913_s10, %s2380_s7 }
 0x3b7   :  { %p1919_p7 = pnand %p1917_p6, %p1914_p5 }
 0x3b9   :  { %1922 = shalt.err (!%p1919_p7)
}
 0x3ba   :  { %1482 = dma.vmem_to_hbm [thread:$0]  %s1480_s30, 32, %s2380_s7, [#allocation3]  }
 0x3bb   :  { %1923 = dma.done.wait [#allocation3], 32  }
 0x3bc   :  { %1924 = vsyncadd [#allocation3], 4294967264 }
 0x3bd   :  { %1486 = vsyncpa [#allocation3], 1 }

</bundles_post_ra>
